<compile_context>
chip_gen: v5e
topology: v5e:2x2
jax: 0.10.0
libtpu: 0.0.40
codegen_flags: <defaults>
</compile_context>

<pallas_src>
import jax
import jax.numpy as jnp
from jax.experimental import pallas as pl
from jax.experimental.pallas import tpu as pltpu

_HID = 128        # hidden dim 64 zero-padded to a full lane width
_TB_MAX = 4096    # upper bound for the batch tile (sweepable)


def critic_kernel(x_ref, w1_ref, b1_ref, w2_ref, b2_ref, w3_ref, b3_ref, out_ref):
    # cast x to bf16 in-kernel (no wrapper-side pad/cast HBM round trip)
    x = x_ref[...].astype(w1_ref.dtype)

    # layer 1: Linear + ReLU (bf16 operands, f32 accumulation / elementwise)
    h = jnp.dot(x, w1_ref[...], preferred_element_type=jnp.float32)
    h = jnp.maximum(h + b1_ref[...], 0.0)

    # layer 2: Linear + ReLU
    h = jnp.dot(h.astype(w2_ref.dtype), w2_ref[...],
                preferred_element_type=jnp.float32)
    h = jnp.maximum(h + b2_ref[...], 0.0)

    # value head: VPU multiply against the (1, H) f32 w3 row + lane reduction.
    # Padded lanes of h and w3 are exact zeros, so they contribute nothing.
    v = jnp.sum(h * w3_ref[...], axis=-1, keepdims=True)   # (tb, 1) f32
    out_ref[...] = v + b3_ref[...]


def _round_up(x, m):
    return ((x + m - 1) // m) * m


def _pad2d(a, rows, cols):
    return jnp.pad(a, ((0, rows - a.shape[0]), (0, cols - a.shape[1])))


def critic_forward(x, params, *, tb=None, matmul_dtype=jnp.bfloat16):
    """x: (B, feature_dim) float32. Returns the critic value, shape (B, 1) f32."""
    w1, b1, w2, b2, w3, b3 = params
    B, F = x.shape
    H = _HID

    if tb is None:
        # Big tiles (per-step overhead dominates small ones), but aim for >= 2
        # grid steps when the batch allows so v7x megacore uses both TCs.
        tb = max(8, min(_TB_MAX, _round_up(pl.cdiv(B, 2), 8)))
    grid = (pl.cdiv(B, tb),)

    # Weights/biases are tiny: zero-pad hidden 64 -> 128 and cast matmul
    # weights to bf16 here.  x itself is passed raw (no pad, no cast).
    w1_p = _pad2d(w1, F, H).astype(matmul_dtype)                  # (F, 128)
    b1_p = _pad2d(b1.reshape(1, -1), 1, H).astype(jnp.float32)    # (1, 128)
    w2_p = _pad2d(w2, H, H).astype(matmul_dtype)                  # (128, 128)
    b2_p = _pad2d(b2.reshape(1, -1), 1, H).astype(jnp.float32)    # (1, 128)
    w3_row = _pad2d(w3.reshape(1, -1), 1, H).astype(jnp.float32)  # (1, 128) f32 row
    b3_p = b3.reshape(1, 1).astype(jnp.float32)                   # (1, 1)

    out = pl.pallas_call(
        critic_kernel,
        out_shape=jax.ShapeDtypeStruct((B, 1), jnp.float32),
        grid=grid,
        in_specs=[
            pl.BlockSpec((tb, F), lambda i: (i, 0)),   # x: batch-tiled, raw f32
            pl.BlockSpec((F, H), lambda i: (0, 0)),    # weights: VMEM-resident
            pl.BlockSpec((1, H), lambda i: (0, 0)),
            pl.BlockSpec((H, H), lambda i: (0, 0)),
            pl.BlockSpec((1, H), lambda i: (0, 0)),
            pl.BlockSpec((1, H), lambda i: (0, 0)),    # w3 as a lane row (f32)
            pl.BlockSpec((1, 1), lambda i: (0, 0)),    # b3 scalar
        ],
        out_specs=pl.BlockSpec((tb, 1), lambda i: (i, 0)),
        compiler_params=pltpu.CompilerParams(
            dimension_semantics=("parallel",),   # megacore sharding on v7x
            vmem_limit_bytes=32 << 20,
        ),
    )(x, w1_p, b1_p, w2_p, b2_p, w3_row, b3_p)

    return out


def init_params(key, feature_dim, hidden=64):
    """Deterministic init mirroring PyTorch nn.Linear defaults.

    Weights are stored transposed vs. PyTorch, i.e. (in_dim, out_dim), so each
    layer is y = x @ W + b.
    """
    ks = jax.random.split(key, 6)

    def linear_init(kw, kb, fan_in, fan_out):
        bound = 1.0 / jnp.sqrt(jnp.float32(fan_in))
        w = jax.random.uniform(kw, (fan_in, fan_out), jnp.float32, -bound, bound)
        b = jax.random.uniform(kb, (fan_out,), jnp.float32, -bound, bound)
        return w, b

    w1, b1 = linear_init(ks[0], ks[1], feature_dim, hidden)
    w2, b2 = linear_init(ks[2], ks[3], hidden, hidden)
    w3, b3 = linear_init(ks[4], ks[5], hidden, 1)
    return (w1, b1, w2, b2, w3, b3)


if __name__ == "__main__":
    feature_dim = 32
    batch = 2

    key = jax.random.PRNGKey(0)
    k_params, k_x = jax.random.split(key)

    params = init_params(k_params, feature_dim)
    x = jax.random.normal(k_x, (batch, feature_dim), jnp.float32)

    value = critic_forward(x, params)
    jax.block_until_ready(value)

    w1, b1, w2, b2, w3, b3 = params

    # f32 reference (exact module semantics)
    h = jnp.maximum(x @ w1 + b1, 0.0)
    h = jnp.maximum(h @ w2 + b2, 0.0)
    v_f32 = h @ w3 + b3

    # mixed-precision reference matching the kernel's dtype path exactly
    bf = jnp.bfloat16
    hb = jnp.maximum(
        jnp.dot(x.astype(bf), w1.astype(bf), preferred_element_type=jnp.float32) + b1, 0.0)
    hb = jnp.maximum(
        jnp.dot(hb.astype(bf), w2.astype(bf), preferred_element_type=jnp.float32) + b2, 0.0)
    v_mixed = jnp.sum(hb * w3.reshape(1, -1), axis=-1, keepdims=True) + b3

    assert value.shape == (batch, 1)
    assert jnp.allclose(value, v_mixed, atol=1e-4, rtol=1e-4), "mismatch vs mixed-precision reference"
    assert jnp.allclose(value, v_f32, atol=3e-2, rtol=3e-2), "mismatch vs f32 reference"

    print("KERNEL_OK")
</pallas_src>

<mosaic_0001>
module attributes {stable_mosaic.version = 11 : i64} {
  func.func @critic_kernel(%arg0: i32, %arg1: memref<8x32xf32, #tpu.memory_space<vmem>>, %arg2: memref<32x128xbf16, #tpu.memory_space<vmem>>, %arg3: memref<1x128xf32, #tpu.memory_space<vmem>>, %arg4: memref<128x128xbf16, #tpu.memory_space<vmem>>, %arg5: memref<1x128xf32, #tpu.memory_space<vmem>>, %arg6: memref<1x128xf32, #tpu.memory_space<vmem>>, %arg7: memref<1x1xf32, #tpu.memory_space<vmem>>, %arg8: memref<8x1xf32, #tpu.memory_space<vmem>>) attributes {dimension_semantics = [#tpu.dimension_semantics<parallel>], iteration_bounds = array<i64: 1>, scalar_prefetch = 0 : i64, scratch_operands = 0 : i64, tpu.core_type = #tpu.core_type<tc>, window_params = [{transform_indices = @transform_0, window_bounds = array<i64: 8, 32>}, {pipeline_mode = #tpu.pipeline_mode<synchronous>, transform_indices = @transform_1, window_bounds = array<i64: 32, 128>}, {pipeline_mode = #tpu.pipeline_mode<synchronous>, transform_indices = @transform_2, window_bounds = array<i64: 1, 128>}, {pipeline_mode = #tpu.pipeline_mode<synchronous>, transform_indices = @transform_3, window_bounds = array<i64: 128, 128>}, {pipeline_mode = #tpu.pipeline_mode<synchronous>, transform_indices = @transform_4, window_bounds = array<i64: 1, 128>}, {pipeline_mode = #tpu.pipeline_mode<synchronous>, transform_indices = @transform_5, window_bounds = array<i64: 1, 128>}, {pipeline_mode = #tpu.pipeline_mode<synchronous>, transform_indices = @transform_6, window_bounds = array<i64: 1, 1>}, {transform_indices = @transform_7, window_bounds = array<i64: 8, 1>}]} {
    %c0 = arith.constant 0 : index
    %c0_0 = arith.constant 0 : index
    %0 = vector.load %arg1[%c0, %c0_0] : memref<8x32xf32, #tpu.memory_space<vmem>>, vector<8x32xf32>
    %1 = arith.truncf %0 : vector<8x32xf32> to vector<8x32xbf16>
    %c0_1 = arith.constant 0 : index
    %c0_2 = arith.constant 0 : index
    %2 = vector.load %arg2[%c0_1, %c0_2] : memref<32x128xbf16, #tpu.memory_space<vmem>>, vector<32x128xbf16>
    %cst = arith.constant dense<0.000000e+00> : vector<8x128xf32>
    %3 = tpu.matmul %1, %2, %cst {dimension_numbers = #tpu.dot_dimension_numbers<[1], [0], [0], [1], [0, 0, 1, 1], [], []>} : vector<8x32xbf16>, vector<32x128xbf16>, vector<8x128xf32> -> vector<8x128xf32>
    %c0_3 = arith.constant 0 : index
    %c0_4 = arith.constant 0 : index
    %4 = vector.load %arg3[%c0_3, %c0_4] : memref<1x128xf32, #tpu.memory_space<vmem>>, vector<1x128xf32>
    %5 = vector.broadcast %4 : vector<1x128xf32> to vector<8x128xf32>
    %6 = arith.addf %3, %5 : vector<8x128xf32>
    %cst_5 = arith.constant 0.000000e+00 : f32
    %7 = vector.broadcast %cst_5 : f32 to vector<8x128xf32>
    %8 = arith.maximumf %6, %7 : vector<8x128xf32>
    %9 = arith.truncf %8 : vector<8x128xf32> to vector<8x128xbf16>
    %c0_6 = arith.constant 0 : index
    %c0_7 = arith.constant 0 : index
    %10 = vector.load %arg4[%c0_6, %c0_7] : memref<128x128xbf16, #tpu.memory_space<vmem>>, vector<128x128xbf16>
    %cst_8 = arith.constant dense<0.000000e+00> : vector<8x128xf32>
    %11 = tpu.matmul %9, %10, %cst_8 {dimension_numbers = #tpu.dot_dimension_numbers<[1], [0], [0], [1], [0, 0, 1, 1], [], []>} : vector<8x128xbf16>, vector<128x128xbf16>, vector<8x128xf32> -> vector<8x128xf32>
    %c0_9 = arith.constant 0 : index
    %c0_10 = arith.constant 0 : index
    %12 = vector.load %arg5[%c0_9, %c0_10] : memref<1x128xf32, #tpu.memory_space<vmem>>, vector<1x128xf32>
    %13 = vector.broadcast %12 : vector<1x128xf32> to vector<8x128xf32>
    %14 = arith.addf %11, %13 : vector<8x128xf32>
    %cst_11 = arith.constant 0.000000e+00 : f32
    %15 = vector.broadcast %cst_11 : f32 to vector<8x128xf32>
    %16 = arith.maximumf %14, %15 : vector<8x128xf32>
    %c0_12 = arith.constant 0 : index
    %c0_13 = arith.constant 0 : index
    %17 = vector.load %arg6[%c0_12, %c0_13] : memref<1x128xf32, #tpu.memory_space<vmem>>, vector<1x128xf32>
    %18 = vector.broadcast %17 : vector<1x128xf32> to vector<8x128xf32>
    %19 = arith.mulf %16, %18 : vector<8x128xf32>
    %cst_14 = arith.constant dense<0.000000e+00> : vector<8xf32>
    %20 = vector.multi_reduction <add>, %19, %cst_14 [1] : vector<8x128xf32> to vector<8xf32>
    %21 = vector.shape_cast %20 : vector<8xf32> to vector<8x1xf32>
    %c0_15 = arith.constant 0 : index
    %c0_16 = arith.constant 0 : index
    %22 = vector.load %arg7[%c0_15, %c0_16] : memref<1x1xf32, #tpu.memory_space<vmem>>, vector<1x1xf32>
    %23 = vector.broadcast %22 : vector<1x1xf32> to vector<8x1xf32>
    %24 = arith.addf %21, %23 : vector<8x1xf32>
    %c0_17 = arith.constant 0 : index
    %c0_18 = arith.constant 0 : index
    %25 = vector.load %arg8[%c0_17, %c0_18] : memref<8x1xf32, #tpu.memory_space<vmem>>, vector<8x1xf32>
    tpu.vector_store %arg8[%c0_17, %c0_18], %24 {strides = array<i32>} : memref<8x1xf32, #tpu.memory_space<vmem>>, vector<8x1xf32>,
    return
  }
  func.func @transform_0(%arg0: i32) -> (i32, i32) {
    %c0_i32 = arith.constant 0 : i32
    %c0_i32_0 = arith.constant 0 : i32
    return %arg0, %c0_i32 : i32, i32
  }
  func.func @transform_1(%arg0: i32) -> (i32, i32) {
    %c0_i32 = arith.constant 0 : i32
    %c0_i32_0 = arith.constant 0 : i32
    %c0_i32_1 = arith.constant 0 : i32
    return %c0_i32, %c0_i32_0 : i32, i32
  }
  func.func @transform_2(%arg0: i32) -> (i32, i32) {
    %c0_i32 = arith.constant 0 : i32
    %c0_i32_0 = arith.constant 0 : i32
    %c0_i32_1 = arith.constant 0 : i32
    return %c0_i32, %c0_i32_0 : i32, i32
  }
  func.func @transform_3(%arg0: i32) -> (i32, i32) {
    %c0_i32 = arith.constant 0 : i32
    %c0_i32_0 = arith.constant 0 : i32
    %c0_i32_1 = arith.constant 0 : i32
    return %c0_i32, %c0_i32_0 : i32, i32
  }
  func.func @transform_4(%arg0: i32) -> (i32, i32) {
    %c0_i32 = arith.constant 0 : i32
    %c0_i32_0 = arith.constant 0 : i32
    %c0_i32_1 = arith.constant 0 : i32
    return %c0_i32, %c0_i32_0 : i32, i32
  }
  func.func @transform_5(%arg0: i32) -> (i32, i32) {
    %c0_i32 = arith.constant 0 : i32
    %c0_i32_0 = arith.constant 0 : i32
    %c0_i32_1 = arith.constant 0 : i32
    return %c0_i32, %c0_i32_0 : i32, i32
  }
  func.func @transform_6(%arg0: i32) -> (i32, i32) {
    %c0_i32 = arith.constant 0 : i32
    %c0_i32_0 = arith.constant 0 : i32
    %c0_i32_1 = arith.constant 0 : i32
    return %c0_i32, %c0_i32_0 : i32, i32
  }
  func.func @transform_7(%arg0: i32) -> (i32, i32) {
    %c0_i32 = arith.constant 0 : i32
    %c0_i32_0 = arith.constant 0 : i32
    return %arg0, %c0_i32 : i32, i32
  }
}

</mosaic_0001>

<bundles_post_ra>
// kernel: tpu_custom_call.1
= control target key start
LH: loop header
LB: loop body
LE: loop exit
PB: predicated region body
PF: predicated region fallthrough
CT: control target
= control target key end

     0   :  { %s420_s0 = inlined_call_operand.vmem [shape: f32[2,32], index: 0, kind: input, shape index: {}]   ;;  %s421_s1 = inlined_call_operand.hbm [shape: bf16[32,128], index: 1, kind: input, shape index: {}]   ;;  %s422_s2 = inlined_call_operand.vmem [shape: f32[1,128], index: 2, kind: input, shape index: {}]   ;;  %s423_s3 = inlined_call_operand.hbm [shape: bf16[128,128], index: 3, kind: input, shape index: {}]   ;;  %s424_s4 = inlined_call_operand.vmem [shape: f32[1,128], index: 4, kind: input, shape index: {}]   ;;  %s425_s5 = inlined_call_operand.vmem [shape: f32[1,128], index: 5, kind: input, shape index: {}]   ;;  %s426_s6 = inlined_call_operand.<no memory space> [shape: f32[1,1], index: 6, kind: input, shape index: {}]   ;;  %s427_s7 = inlined_call_operand.vmem [shape: f32[2,1], index: 7, kind: output, shape index: {}]  }
   0x1   :  { %v12_v0 = vstv %s426_s6 }
   0x2   :  { %13 = vst [vmem:[#allocation2] sm:$0x1] %v12_v0 }
   0x3   :  { %14 = vsyncpa [#allocation4], 0  ;;  %s22_s28 = sshll.u32 %s421_s1, 4  ;;  %s23_s28 = int_to_ptr.hbm [resolvable:$true] %s22_s28 }
   0x4   :  { %15 = vsyncpa [#allocation6], 0  ;;  %s352_s29 = smov [#allocation3]   ;;  %s37_s10 = sshll.u32 %s423_s3, 4  ;;  %s38_s10 = int_to_ptr.hbm [resolvable:$true] %s37_s10 }
   0x5   :  { %s24_s30 = sshll.u32 %s352_s29, 4  ;;  %s353_s11 = smov 64   ;;  %s25_s30 = int_to_ptr.vmem [resolvable:$true] %s24_s30 }
   0x6   :  { %s354_s12 = smov 4   ;;  %s355_s6 = smov [#allocation5]  }
   0x7   :  { %30 = dma.hbm_to_vmem [thread:$0]  %s23_s28, 256, %s25_s30, [#allocation4], %s353_s11, %s353_s11, %s354_s12  }
   0x8   :  { %s39_s13 = sshll.u32 %s355_s6, 4  ;;  %s40_s13 = int_to_ptr.vmem [resolvable:$true] %s39_s13 }
   0x9   :  { %45 = dma.hbm_to_vmem [thread:$0]  %s38_s10, 1024, %s40_s13, [#allocation6], %s353_s11, %s353_s11, %s354_s12  }
   0xa   :  { %348 = dma.done.wait [#allocation4], 256  }
   0xb   :  { %349 = vsyncadd [#allocation4], 4294967040 }
   0xc   :  { %350 = dma.done.wait [#allocation6], 1024  }
   0xd   :  { %351 = vsyncadd [#allocation6], 4294966272  ;;  %v283_v1 = vld [vmem:[#allocation3 + $0x8] sm:$0xff]  ;;  %v282_v3 = vld [vmem:[#allocation3] sm:$0xff]  ;;  %vm83_vm0 = vcmask 261120   ;;  %vm196_vm1 = vcmask 7168  }
   0xe   :  { %v291_v2 = vld [vmem:[#allocation5 + $0x38] sm:$0xff]  ;;  %93 = vmatpush.bf16.msra.mxu0 %v283_v1  ;;  %v61_v4 = vld [vmem:[%s420_s0] sm:$0xff]  ;;  %v288_v8 = vld [vmem:[#allocation5 + $0x20] sm:$0xff] }
   0xf   :  { %170 = vmatpush.bf16.msra.mxu1 %v291_v2  ;;  %v290_v5 = vld [vmem:[#allocation5 + $0x30] sm:$0xff]  ;;  %v62_v6 = vpack.c.bf16 %v61_v4, %v61_v4  ;;  %v289_v7 = vld [vmem:[#allocation5 + $0x28] sm:$0xff]  ;;  %v287_v9 = vld [vmem:[#allocation5 + $0x18] sm:$0xff] }
  0x10   :  { %v286_v10 = vld [vmem:[#allocation5 + $0x10] sm:$0xff]  ;;  %v285_v11 = vld [vmem:[#allocation5 + $0x8] sm:$0xff]  ;;  %v284_v12 = vld [vmem:[#allocation5] sm:$0xff] }
  0x11   :  { %v296_v13 = vld [vmem:[%s422_s2] ss:$0 sm:$0xff] }
  0x12   :  { %94 = vmatpush.bf16.msra.mxu0 %v282_v3  ;;  %v297_v19 = vld [vmem:[%s424_s4] ss:$0 sm:$0xff] }
  0x13   :  { %171 = vmatpush.bf16.msra.mxu1 %v290_v5  ;;  %v298_v22 = vld [vmem:[%s425_s5] ss:$0 sm:$0xff] }
  0x14   :  { %v299_v26 = vld [vmem:[#allocation2] ss:$0 sm:$0xff] }
  0x15   :  { %249 = vmatmul.msk.bf16.vlgmr.msra.gmra.mxu0 %vm83_vm0, %v62_v6 }
  0x17   :  { %172 = vmatpush.bf16.msra.mxu1 %v289_v7 }
  0x1b   :  { %173 = vmatpush.bf16.msra.mxu1 %v288_v8 }
  0x1f   :  { %174 = vmatpush.bf16.msra.mxu1 %v287_v9 }
  0x23   :  { %175 = vmatpush.bf16.msra.mxu1 %v286_v10 }
  0x27   :  { %176 = vmatpush.bf16.msra.mxu1 %v285_v11 }
  0x2b   :  { %177 = vmatpush.bf16.msra.mxu1 %v284_v12 }
  0x92   :  { %v96_v14 = vpop.f32.mrf.mxu0 }
  0x93   :  { %v97_v15 = vadd.f32 %v296_v13, %v96_v14 }
  0x95   :  { %v100_v16 = vmax.f32 %v97_v15, 0.0 }
  0x97   :  { %v101_v17 = vpack.c.bf16 %v100_v16, %v100_v16 }
  0x99   :  { %178 = vmatmul.bf16.vlgmr.msra.gmra.mxu1 %v101_v17 }
  0x9a   :  { %v98_v18 = vpop.f32.mrf.mxu0 }
 0x116   :  { %v179_v20 = vpop.f32.mrf.mxu1 }
 0x117   :  { %v180_v21 = vadd.f32 %v297_v19, %v179_v20 }
 0x119   :  { %v183_v23 = vmax.f32 %v180_v21, 0.0 }
 0x11b   :  { %v188_v24 = vmul.f32 %v298_v22, %v183_v23 }
 0x11d   :  { %189 = vadd.xlane.f32.xlu0 %v188_v24 }
 0x11e   :  { %v181_v25 = vpop.f32.mrf.mxu1 }
 0x190   :  { %v190_v27 = vpop.xlane.xlu0 %189 }
 0x191   :  { %v195_v28 = vadd.f32 %v299_v26, %v190_v27 }
 0x193   :  { %197 = vst.msk [vmem:[#allocation7] sm:$0xff] %vm196_vm1, %v195_v28 }
 0x19a   :  { %v216_v29 = vld [vmem:[#allocation7] sm:$0x3] }
 0x19b   :  { %217 = vst [vmem:[%s427_s7] sm:$0x3] %v216_v29 }
 0x19c   :  { %235 = vsyncpa [#allocation4], 1 }
 0x19d   :  { %236 = vsyncpa [#allocation6], 1 }

</bundles_post_ra>
